<compile_context>
chip_gen: v5e
topology: v5e:2x2
jax: 0.10.0
libtpu: 0.0.40
codegen_flags: <defaults>
</compile_context>

<pallas_src>
import functools

import jax
import jax.numpy as jnp
from jax import lax
from jax.experimental import pallas as pl
from jax.experimental.pallas import tpu as pltpu


# -----------------------------------------------------------------------------
# Fused forward kernel (single pallas_call, single grid point)
# -----------------------------------------------------------------------------
def _actor_fused_kernel(*refs, num_blocks, softplus_start):
    """refs = [state,
               w0, b0, w1, b1,                     # initial: Linear+GLU, Linear+GLU
               (gamma, beta, wb1, bb1, wb2, bb2) * num_blocks,
               gamma_f, beta_f, wf, bf,            # final norm + final linear (GLU)
               heads_w, heads_b,                   # all heads fused, padded to 128
               o_ref]                              # (B, 128) padded output
    """
    o_ref = refs[-1]
    it = iter(refs[:-1])
    x_ref = next(it)
    w0_ref, b0_ref = next(it), next(it)
    w1_ref, b1_ref = next(it), next(it)
    block_refs = [tuple(next(it) for _ in range(6)) for _ in range(num_blocks)]
    gf_ref, betaf_ref = next(it), next(it)
    wf_ref, bf_ref = next(it), next(it)
    hw_ref, hb_ref = next(it), next(it)

    def glu_linear(x, w_ref, b_ref):
        # One fused (in, 2N) matmul; slice halves in-register (F.glu(dim=1)).
        y = jnp.dot(x, w_ref[...], preferred_element_type=jnp.float32) + b_ref[...]
        n = y.shape[-1] // 2
        return y[:, :n] * jax.nn.sigmoid(y[:, n:])

    def layernorm(x, gamma, beta, eps=1e-5):
        mu = jnp.mean(x, axis=-1, keepdims=True)
        var = jnp.mean((x - mu) * (x - mu), axis=-1, keepdims=True)
        return (x - mu) * lax.rsqrt(var + eps) * gamma + beta

    # ---- initial: Linear+GLU, Linear+GLU ------------------------------------
    x = x_ref[...]
    x = glu_linear(x, w0_ref, b0_ref)
    x = glu_linear(x, w1_ref, b1_ref)

    # ---- GLU blocks (statically unrolled) -----------------------------------
    for gamma_ref, beta_ref, wb1_ref, bb1_ref, wb2_ref, bb2_ref in block_refs:
        h = layernorm(x, gamma_ref[...], beta_ref[...])
        glu = glu_linear(h, wb1_ref, bb1_ref)
        x = jnp.dot(glu, wb2_ref[...],
                    preferred_element_type=jnp.float32) + bb2_ref[...] + x

    # ---- final norm + final linear + GLU ------------------------------------
    h = layernorm(x, gf_ref[...], betaf_ref[...])
    x = glu_linear(h, wf_ref, bf_ref)

    # ---- fused heads (lane-dense, padded to 128 output columns) -------------
    logits = jnp.dot(x, hw_ref[...], preferred_element_type=jnp.float32) + hb_ref[...]
    # One-shot epilogue mask (not inside any loop): softplus on alpha/beta
    # columns (>= softplus_start). Padded zero columns also get softplus'd but
    # are sliced off outside the kernel, so only the real lanes matter.
    col = lax.broadcasted_iota(jnp.int32, logits.shape, 1)
    o_ref[...] = jnp.where(col >= softplus_start, jax.nn.softplus(logits), logits)


def actor_forward(params, state, num_categories, num_continuous):
    """Full forward pass in a single fused pallas_call + output split glue."""
    num_blocks = len(params["blocks"])
    inputs = [state, params["w0"], params["b0"], params["w1"], params["b1"]]
    for bp in params["blocks"]:
        inputs += [bp["gamma"], bp["beta"], bp["w1"], bp["b1"], bp["w2"], bp["b2"]]
    f = params["final"]
    inputs += [f["gamma"], f["beta"], f["w"], f["b"],
               params["heads_w"], params["heads_b"]]

    B = state.shape[0]
    padded_width = params["heads_w"].shape[1]          # 128 (lane-dense output)
    kern = functools.partial(_actor_fused_kernel,
                             num_blocks=num_blocks,
                             softplus_start=params["softplus_start"])
    out = pl.pallas_call(
        kern,
        out_shape=jax.ShapeDtypeStruct((B, padded_width), jnp.float32),
        in_specs=[pl.BlockSpec(memory_space=pltpu.MemorySpace.VMEM)] * len(inputs),
        out_specs=pl.BlockSpec(memory_space=pltpu.MemorySpace.VMEM),
    )(*inputs)

    # glue: drop lane padding and split the combined head output back into lists
    out = out[:, :params["heads_width"]]
    cat_logits, off = [], 0
    for n in num_categories:
        cat_logits.append(out[:, off:off + n])
        off += n
    alphas = [out[:, off + i:off + i + 1] for i in range(num_continuous)]
    off += num_continuous
    betas = [out[:, off + i:off + i + 1] for i in range(num_continuous)]
    return cat_logits, alphas, betas


# -----------------------------------------------------------------------------
# Parameter construction (deterministic synthetic init)
# -----------------------------------------------------------------------------
def _linear_params(key, in_dim, out_dim):
    kw, kb = jax.random.split(key)
    scale = 1.0 / jnp.sqrt(jnp.float32(in_dim))
    w = jax.random.normal(kw, (in_dim, out_dim), jnp.float32) * scale  # transposed
    b = jax.random.normal(kb, (1, out_dim), jnp.float32) * 0.01
    return w, b


def init_actor_params(key, state_dim, num_categories, num_continuous, num_blocks, N,
                      head_pad=128):
    num_heads = len(num_categories) + 2 * num_continuous
    keys = jax.random.split(key, 3 + 2 * num_blocks + num_heads)
    ki = iter(keys)
    p = {}

    # initial: Linear(state_dim, 2N)+GLU, Linear(N, 2N)+GLU  (fused 2N weights)
    p["w0"], p["b0"] = _linear_params(next(ki), state_dim, 2 * N)
    p["w1"], p["b1"] = _linear_params(next(ki), N, 2 * N)

    # GLU blocks
    p["blocks"] = []
    for _ in range(num_blocks):
        w1_, b1_ = _linear_params(next(ki), N, 2 * N)
        w2_, b2_ = _linear_params(next(ki), N, N)
        p["blocks"].append(dict(
            gamma=jnp.ones((1, N), jnp.float32),
            beta=jnp.zeros((1, N), jnp.float32),
            w1=w1_, b1=b1_, w2=w2_, b2=b2_))

    # final norm + final linear (2N) + GLU
    wf, bf = _linear_params(next(ki), N, 2 * N)
    p["final"] = dict(gamma=jnp.ones((1, N), jnp.float32),
                      beta=jnp.zeros((1, N), jnp.float32),
                      w=wf, b=bf)

    # heads: categorical + alpha + beta, fused into one weight matrix,
    # zero-padded along the output (lane) axis to `head_pad` columns.
    head_dims = list(num_categories) + [1] * num_continuous + [1] * num_continuous
    ws, bs = [], []
    for d in head_dims:
        w, b = _linear_params(next(ki), N, d)
        ws.append(w)
        bs.append(b)
    hw = jnp.concatenate(ws, axis=1)
    hb = jnp.concatenate(bs, axis=1)
    width = hw.shape[1]
    pad = head_pad - width
    p["heads_w"] = jnp.pad(hw, ((0, 0), (0, pad)))
    p["heads_b"] = jnp.pad(hb, ((0, 0), (0, pad)))
    p["heads_width"] = width
    p["softplus_start"] = int(sum(num_categories))
    return p


# -----------------------------------------------------------------------------
# Pure-JAX reference (numerical sanity check)
# -----------------------------------------------------------------------------
def _ref_forward(params, state, num_categories, num_continuous):
    def glu_lin(x, w, b):
        y = x @ w + b
        n = y.shape[-1] // 2
        return y[:, :n] * jax.nn.sigmoid(y[:, n:])

    def ln(x, gamma, beta, eps=1e-5):
        mu = jnp.mean(x, -1, keepdims=True)
        var = jnp.mean((x - mu) ** 2, -1, keepdims=True)
        return (x - mu) / jnp.sqrt(var + eps) * gamma + beta

    x = glu_lin(state, params["w0"], params["b0"])
    x = glu_lin(x, params["w1"], params["b1"])
    for bp in params["blocks"]:
        h = ln(x, bp["gamma"], bp["beta"])
        glu = glu_lin(h, bp["w1"], bp["b1"])
        x = glu @ bp["w2"] + bp["b2"] + x
    f = params["final"]
    h = ln(x, f["gamma"], f["beta"])
    x = glu_lin(h, f["w"], f["b"])
    width = params["heads_width"]
    out = x @ params["heads_w"][:, :width] + params["heads_b"][:, :width]
    sp = params["softplus_start"]
    out = out.at[:, sp:].set(jax.nn.softplus(out[:, sp:]))
    cat_logits, off = [], 0
    for n in num_categories:
        cat_logits.append(out[:, off:off + n]); off += n
    alphas = [out[:, off + i:off + i + 1] for i in range(num_continuous)]
    off += num_continuous
    betas = [out[:, off + i:off + i + 1] for i in range(num_continuous)]
    return cat_logits, alphas, betas


# -----------------------------------------------------------------------------
if __name__ == "__main__":
    # small, module-consistent shapes
    B = 8                      # batch
    STATE_DIM = 16
    NUM_NEURONS = 32
    NUM_BLOCKS = 2
    NUM_CATEGORIES = [3, 5]
    NUM_CONTINUOUS = 2

    key = jax.random.PRNGKey(0)
    k_state, k_params = jax.random.split(key)
    state = jax.random.normal(k_state, (B, STATE_DIM), jnp.float32)
    params = init_actor_params(k_params, STATE_DIM, NUM_CATEGORIES,
                               NUM_CONTINUOUS, NUM_BLOCKS, NUM_NEURONS)

    cat_logits, alphas, betas = actor_forward(
        params, state, NUM_CATEGORIES, NUM_CONTINUOUS)
    jax.block_until_ready((cat_logits, alphas, betas))

    # sanity check vs pure-JAX reference
    r_cat, r_a, r_b = _ref_forward(params, state, NUM_CATEGORIES, NUM_CONTINUOUS)
    for got, ref in zip(cat_logits + alphas + betas, r_cat + r_a + r_b):
        assert jnp.allclose(got, ref, rtol=1e-4, atol=1e-4), "mismatch vs reference"

    print("KERNEL_OK")
</pallas_src>

<mosaic_0001>
module attributes {stable_mosaic.version = 11 : i64} {
  func.func @_actor_fused_kernel(%arg0: memref<8x16xf32, #tpu.memory_space<vmem>>, %arg1: memref<16x64xf32, #tpu.memory_space<vmem>>, %arg2: memref<1x64xf32, #tpu.memory_space<vmem>>, %arg3: memref<32x64xf32, #tpu.memory_space<vmem>>, %arg4: memref<1x64xf32, #tpu.memory_space<vmem>>, %arg5: memref<1x32xf32, #tpu.memory_space<vmem>>, %arg6: memref<1x32xf32, #tpu.memory_space<vmem>>, %arg7: memref<32x64xf32, #tpu.memory_space<vmem>>, %arg8: memref<1x64xf32, #tpu.memory_space<vmem>>, %arg9: memref<32x32xf32, #tpu.memory_space<vmem>>, %arg10: memref<1x32xf32, #tpu.memory_space<vmem>>, %arg11: memref<1x32xf32, #tpu.memory_space<vmem>>, %arg12: memref<1x32xf32, #tpu.memory_space<vmem>>, %arg13: memref<32x64xf32, #tpu.memory_space<vmem>>, %arg14: memref<1x64xf32, #tpu.memory_space<vmem>>, %arg15: memref<32x32xf32, #tpu.memory_space<vmem>>, %arg16: memref<1x32xf32, #tpu.memory_space<vmem>>, %arg17: memref<1x32xf32, #tpu.memory_space<vmem>>, %arg18: memref<1x32xf32, #tpu.memory_space<vmem>>, %arg19: memref<32x64xf32, #tpu.memory_space<vmem>>, %arg20: memref<1x64xf32, #tpu.memory_space<vmem>>, %arg21: memref<32x128xf32, #tpu.memory_space<vmem>>, %arg22: memref<1x128xf32, #tpu.memory_space<vmem>>, %arg23: memref<8x128xf32, #tpu.memory_space<vmem>>) attributes {dimension_semantics = [], scalar_prefetch = 0 : i64, scratch_operands = 0 : i64, tpu.core_type = #tpu.core_type<tc>} {
    %c0 = arith.constant 0 : index
    %c0_0 = arith.constant 0 : index
    %0 = vector.load %arg0[%c0, %c0_0] : memref<8x16xf32, #tpu.memory_space<vmem>>, vector<8x16xf32>
    %c0_1 = arith.constant 0 : index
    %c0_2 = arith.constant 0 : index
    %1 = vector.load %arg1[%c0_1, %c0_2] : memref<16x64xf32, #tpu.memory_space<vmem>>, vector<16x64xf32>
    %cst = arith.constant dense<0.000000e+00> : vector<8x64xf32>
    %2 = tpu.matmul %0, %1, %cst {dimension_numbers = #tpu.dot_dimension_numbers<[1], [0], [0], [1], [0, 0, 1, 1], [], []>} : vector<8x16xf32>, vector<16x64xf32>, vector<8x64xf32> -> vector<8x64xf32>
    %c0_3 = arith.constant 0 : index
    %c0_4 = arith.constant 0 : index
    %3 = vector.load %arg2[%c0_3, %c0_4] : memref<1x64xf32, #tpu.memory_space<vmem>>, vector<1x64xf32>
    %4 = vector.broadcast %3 : vector<1x64xf32> to vector<8x64xf32>
    %5 = arith.addf %2, %4 : vector<8x64xf32>
    %6 = vector.extract_strided_slice %5 {offsets = [0, 0], sizes = [8, 32], strides = [1, 1]} : vector<8x64xf32> to vector<8x32xf32>
    %7 = vector.extract_strided_slice %5 {offsets = [0, 32], sizes = [8, 32], strides = [1, 1]} : vector<8x64xf32> to vector<8x32xf32>
    %8 = arith.negf %7 : vector<8x32xf32>
    %9 = math.exp %8 : vector<8x32xf32>
    %cst_5 = arith.constant 1.000000e+00 : f32
    %10 = vector.broadcast %cst_5 : f32 to vector<8x32xf32>
    %11 = arith.addf %10, %9 : vector<8x32xf32>
    %12 = arith.divf %10, %11 : vector<8x32xf32>
    %13 = arith.mulf %6, %12 : vector<8x32xf32>
    %c0_6 = arith.constant 0 : index
    %c0_7 = arith.constant 0 : index
    %14 = vector.load %arg3[%c0_6, %c0_7] : memref<32x64xf32, #tpu.memory_space<vmem>>, vector<32x64xf32>
    %cst_8 = arith.constant dense<0.000000e+00> : vector<8x64xf32>
    %15 = tpu.matmul %13, %14, %cst_8 {dimension_numbers = #tpu.dot_dimension_numbers<[1], [0], [0], [1], [0, 0, 1, 1], [], []>} : vector<8x32xf32>, vector<32x64xf32>, vector<8x64xf32> -> vector<8x64xf32>
    %c0_9 = arith.constant 0 : index
    %c0_10 = arith.constant 0 : index
    %16 = vector.load %arg4[%c0_9, %c0_10] : memref<1x64xf32, #tpu.memory_space<vmem>>, vector<1x64xf32>
    %17 = vector.broadcast %16 : vector<1x64xf32> to vector<8x64xf32>
    %18 = arith.addf %15, %17 : vector<8x64xf32>
    %19 = vector.extract_strided_slice %18 {offsets = [0, 0], sizes = [8, 32], strides = [1, 1]} : vector<8x64xf32> to vector<8x32xf32>
    %20 = vector.extract_strided_slice %18 {offsets = [0, 32], sizes = [8, 32], strides = [1, 1]} : vector<8x64xf32> to vector<8x32xf32>
    %21 = arith.negf %20 : vector<8x32xf32>
    %22 = math.exp %21 : vector<8x32xf32>
    %cst_11 = arith.constant 1.000000e+00 : f32
    %23 = vector.broadcast %cst_11 : f32 to vector<8x32xf32>
    %24 = arith.addf %23, %22 : vector<8x32xf32>
    %25 = arith.divf %23, %24 : vector<8x32xf32>
    %26 = arith.mulf %19, %25 : vector<8x32xf32>
    %c0_12 = arith.constant 0 : index
    %c0_13 = arith.constant 0 : index
    %27 = vector.load %arg5[%c0_12, %c0_13] : memref<1x32xf32, #tpu.memory_space<vmem>>, vector<1x32xf32>
    %c0_14 = arith.constant 0 : index
    %c0_15 = arith.constant 0 : index
    %28 = vector.load %arg6[%c0_14, %c0_15] : memref<1x32xf32, #tpu.memory_space<vmem>>, vector<1x32xf32>
    %cst_16 = arith.constant dense<0.000000e+00> : vector<8xf32>
    %29 = vector.multi_reduction <add>, %26, %cst_16 [1] : vector<8x32xf32> to vector<8xf32>
    %30 = vector.shape_cast %29 : vector<8xf32> to vector<8x1xf32>
    %cst_17 = arith.constant 3.200000e+01 : f32
    %31 = vector.broadcast %cst_17 : f32 to vector<8x1xf32>
    %32 = arith.divf %30, %31 : vector<8x1xf32>
    %33 = vector.broadcast %32 : vector<8x1xf32> to vector<8x32xf32>
    %34 = arith.subf %26, %33 : vector<8x32xf32>
    %35 = vector.broadcast %32 : vector<8x1xf32> to vector<8x32xf32>
    %36 = arith.subf %26, %35 : vector<8x32xf32>
    %37 = arith.mulf %34, %36 : vector<8x32xf32>
    %cst_18 = arith.constant dense<0.000000e+00> : vector<8xf32>
    %38 = vector.multi_reduction <add>, %37, %cst_18 [1] : vector<8x32xf32> to vector<8xf32>
    %39 = vector.shape_cast %38 : vector<8xf32> to vector<8x1xf32>
    %cst_19 = arith.constant 3.200000e+01 : f32
    %40 = vector.broadcast %cst_19 : f32 to vector<8x1xf32>
    %41 = arith.divf %39, %40 : vector<8x1xf32>
    %42 = vector.broadcast %32 : vector<8x1xf32> to vector<8x32xf32>
    %43 = arith.subf %26, %42 : vector<8x32xf32>
    %cst_20 = arith.constant 9.99999974E-6 : f32
    %44 = vector.broadcast %cst_20 : f32 to vector<8x1xf32>
    %45 = arith.addf %41, %44 : vector<8x1xf32>
    %46 = math.rsqrt %45 : vector<8x1xf32>
    %47 = vector.broadcast %46 : vector<8x1xf32> to vector<8x32xf32>
    %48 = arith.mulf %43, %47 : vector<8x32xf32>
    %49 = vector.broadcast %27 : vector<1x32xf32> to vector<8x32xf32>
    %50 = arith.mulf %48, %49 : vector<8x32xf32>
    %51 = vector.broadcast %28 : vector<1x32xf32> to vector<8x32xf32>
    %52 = arith.addf %50, %51 : vector<8x32xf32>
    %c0_21 = arith.constant 0 : index
    %c0_22 = arith.constant 0 : index
    %53 = vector.load %arg7[%c0_21, %c0_22] : memref<32x64xf32, #tpu.memory_space<vmem>>, vector<32x64xf32>
    %cst_23 = arith.constant dense<0.000000e+00> : vector<8x64xf32>
    %54 = tpu.matmul %52, %53, %cst_23 {dimension_numbers = #tpu.dot_dimension_numbers<[1], [0], [0], [1], [0, 0, 1, 1], [], []>} : vector<8x32xf32>, vector<32x64xf32>, vector<8x64xf32> -> vector<8x64xf32>
    %c0_24 = arith.constant 0 : index
    %c0_25 = arith.constant 0 : index
    %55 = vector.load %arg8[%c0_24, %c0_25] : memref<1x64xf32, #tpu.memory_space<vmem>>, vector<1x64xf32>
    %56 = vector.broadcast %55 : vector<1x64xf32> to vector<8x64xf32>
    %57 = arith.addf %54, %56 : vector<8x64xf32>
    %58 = vector.extract_strided_slice %57 {offsets = [0, 0], sizes = [8, 32], strides = [1, 1]} : vector<8x64xf32> to vector<8x32xf32>
    %59 = vector.extract_strided_slice %57 {offsets = [0, 32], sizes = [8, 32], strides = [1, 1]} : vector<8x64xf32> to vector<8x32xf32>
    %60 = arith.negf %59 : vector<8x32xf32>
    %61 = math.exp %60 : vector<8x32xf32>
    %cst_26 = arith.constant 1.000000e+00 : f32
    %62 = vector.broadcast %cst_26 : f32 to vector<8x32xf32>
    %63 = arith.addf %62, %61 : vector<8x32xf32>
    %64 = arith.divf %62, %63 : vector<8x32xf32>
    %65 = arith.mulf %58, %64 : vector<8x32xf32>
    %c0_27 = arith.constant 0 : index
    %c0_28 = arith.constant 0 : index
    %66 = vector.load %arg9[%c0_27, %c0_28] : memref<32x32xf32, #tpu.memory_space<vmem>>, vector<32x32xf32>
    %cst_29 = arith.constant dense<0.000000e+00> : vector<8x32xf32>
    %67 = tpu.matmul %65, %66, %cst_29 {dimension_numbers = #tpu.dot_dimension_numbers<[1], [0], [0], [1], [0, 0, 1, 1], [], []>} : vector<8x32xf32>, vector<32x32xf32>, vector<8x32xf32> -> vector<8x32xf32>
    %c0_30 = arith.constant 0 : index
    %c0_31 = arith.constant 0 : index
    %68 = vector.load %arg10[%c0_30, %c0_31] : memref<1x32xf32, #tpu.memory_space<vmem>>, vector<1x32xf32>
    %69 = vector.broadcast %68 : vector<1x32xf32> to vector<8x32xf32>
    %70 = arith.addf %67, %69 : vector<8x32xf32>
    %71 = arith.addf %70, %26 : vector<8x32xf32>
    %c0_32 = arith.constant 0 : index
    %c0_33 = arith.constant 0 : index
    %72 = vector.load %arg11[%c0_32, %c0_33] : memref<1x32xf32, #tpu.memory_space<vmem>>, vector<1x32xf32>
    %c0_34 = arith.constant 0 : index
    %c0_35 = arith.constant 0 : index
    %73 = vector.load %arg12[%c0_34, %c0_35] : memref<1x32xf32, #tpu.memory_space<vmem>>, vector<1x32xf32>
    %cst_36 = arith.constant dense<0.000000e+00> : vector<8xf32>
    %74 = vector.multi_reduction <add>, %71, %cst_36 [1] : vector<8x32xf32> to vector<8xf32>
    %75 = vector.shape_cast %74 : vector<8xf32> to vector<8x1xf32>
    %cst_37 = arith.constant 3.200000e+01 : f32
    %76 = vector.broadcast %cst_37 : f32 to vector<8x1xf32>
    %77 = arith.divf %75, %76 : vector<8x1xf32>
    %78 = vector.broadcast %77 : vector<8x1xf32> to vector<8x32xf32>
    %79 = arith.subf %71, %78 : vector<8x32xf32>
    %80 = vector.broadcast %77 : vector<8x1xf32> to vector<8x32xf32>
    %81 = arith.subf %71, %80 : vector<8x32xf32>
    %82 = arith.mulf %79, %81 : vector<8x32xf32>
    %cst_38 = arith.constant dense<0.000000e+00> : vector<8xf32>
    %83 = vector.multi_reduction <add>, %82, %cst_38 [1] : vector<8x32xf32> to vector<8xf32>
    %84 = vector.shape_cast %83 : vector<8xf32> to vector<8x1xf32>
    %cst_39 = arith.constant 3.200000e+01 : f32
    %85 = vector.broadcast %cst_39 : f32 to vector<8x1xf32>
    %86 = arith.divf %84, %85 : vector<8x1xf32>
    %87 = vector.broadcast %77 : vector<8x1xf32> to vector<8x32xf32>
    %88 = arith.subf %71, %87 : vector<8x32xf32>
    %cst_40 = arith.constant 9.99999974E-6 : f32
    %89 = vector.broadcast %cst_40 : f32 to vector<8x1xf32>
    %90 = arith.addf %86, %89 : vector<8x1xf32>
    %91 = math.rsqrt %90 : vector<8x1xf32>
    %92 = vector.broadcast %91 : vector<8x1xf32> to vector<8x32xf32>
    %93 = arith.mulf %88, %92 : vector<8x32xf32>
    %94 = vector.broadcast %72 : vector<1x32xf32> to vector<8x32xf32>
    %95 = arith.mulf %93, %94 : vector<8x32xf32>
    %96 = vector.broadcast %73 : vector<1x32xf32> to vector<8x32xf32>
    %97 = arith.addf %95, %96 : vector<8x32xf32>
    %c0_41 = arith.constant 0 : index
    %c0_42 = arith.constant 0 : index
    %98 = vector.load %arg13[%c0_41, %c0_42] : memref<32x64xf32, #tpu.memory_space<vmem>>, vector<32x64xf32>
    %cst_43 = arith.constant dense<0.000000e+00> : vector<8x64xf32>
    %99 = tpu.matmul %97, %98, %cst_43 {dimension_numbers = #tpu.dot_dimension_numbers<[1], [0], [0], [1], [0, 0, 1, 1], [], []>} : vector<8x32xf32>, vector<32x64xf32>, vector<8x64xf32> -> vector<8x64xf32>
    %c0_44 = arith.constant 0 : index
    %c0_45 = arith.constant 0 : index
    %100 = vector.load %arg14[%c0_44, %c0_45] : memref<1x64xf32, #tpu.memory_space<vmem>>, vector<1x64xf32>
    %101 = vector.broadcast %100 : vector<1x64xf32> to vector<8x64xf32>
    %102 = arith.addf %99, %101 : vector<8x64xf32>
    %103 = vector.extract_strided_slice %102 {offsets = [0, 0], sizes = [8, 32], strides = [1, 1]} : vector<8x64xf32> to vector<8x32xf32>
    %104 = vector.extract_strided_slice %102 {offsets = [0, 32], sizes = [8, 32], strides = [1, 1]} : vector<8x64xf32> to vector<8x32xf32>
    %105 = arith.negf %104 : vector<8x32xf32>
    %106 = math.exp %105 : vector<8x32xf32>
    %cst_46 = arith.constant 1.000000e+00 : f32
    %107 = vector.broadcast %cst_46 : f32 to vector<8x32xf32>
    %108 = arith.addf %107, %106 : vector<8x32xf32>
    %109 = arith.divf %107, %108 : vector<8x32xf32>
    %110 = arith.mulf %103, %109 : vector<8x32xf32>
    %c0_47 = arith.constant 0 : index
    %c0_48 = arith.constant 0 : index
    %111 = vector.load %arg15[%c0_47, %c0_48] : memref<32x32xf32, #tpu.memory_space<vmem>>, vector<32x32xf32>
    %cst_49 = arith.constant dense<0.000000e+00> : vector<8x32xf32>
    %112 = tpu.matmul %110, %111, %cst_49 {dimension_numbers = #tpu.dot_dimension_numbers<[1], [0], [0], [1], [0, 0, 1, 1], [], []>} : vector<8x32xf32>, vector<32x32xf32>, vector<8x32xf32> -> vector<8x32xf32>
    %c0_50 = arith.constant 0 : index
    %c0_51 = arith.constant 0 : index
    %113 = vector.load %arg16[%c0_50, %c0_51] : memref<1x32xf32, #tpu.memory_space<vmem>>, vector<1x32xf32>
    %114 = vector.broadcast %113 : vector<1x32xf32> to vector<8x32xf32>
    %115 = arith.addf %112, %114 : vector<8x32xf32>
    %116 = arith.addf %115, %71 : vector<8x32xf32>
    %c0_52 = arith.constant 0 : index
    %c0_53 = arith.constant 0 : index
    %117 = vector.load %arg17[%c0_52, %c0_53] : memref<1x32xf32, #tpu.memory_space<vmem>>, vector<1x32xf32>
    %c0_54 = arith.constant 0 : index
    %c0_55 = arith.constant 0 : index
    %118 = vector.load %arg18[%c0_54, %c0_55] : memref<1x32xf32, #tpu.memory_space<vmem>>, vector<1x32xf32>
    %cst_56 = arith.constant dense<0.000000e+00> : vector<8xf32>
    %119 = vector.multi_reduction <add>, %116, %cst_56 [1] : vector<8x32xf32> to vector<8xf32>
    %120 = vector.shape_cast %119 : vector<8xf32> to vector<8x1xf32>
    %cst_57 = arith.constant 3.200000e+01 : f32
    %121 = vector.broadcast %cst_57 : f32 to vector<8x1xf32>
    %122 = arith.divf %120, %121 : vector<8x1xf32>
    %123 = vector.broadcast %122 : vector<8x1xf32> to vector<8x32xf32>
    %124 = arith.subf %116, %123 : vector<8x32xf32>
    %125 = vector.broadcast %122 : vector<8x1xf32> to vector<8x32xf32>
    %126 = arith.subf %116, %125 : vector<8x32xf32>
    %127 = arith.mulf %124, %126 : vector<8x32xf32>
    %cst_58 = arith.constant dense<0.000000e+00> : vector<8xf32>
    %128 = vector.multi_reduction <add>, %127, %cst_58 [1] : vector<8x32xf32> to vector<8xf32>
    %129 = vector.shape_cast %128 : vector<8xf32> to vector<8x1xf32>
    %cst_59 = arith.constant 3.200000e+01 : f32
    %130 = vector.broadcast %cst_59 : f32 to vector<8x1xf32>
    %131 = arith.divf %129, %130 : vector<8x1xf32>
    %132 = vector.broadcast %122 : vector<8x1xf32> to vector<8x32xf32>
    %133 = arith.subf %116, %132 : vector<8x32xf32>
    %cst_60 = arith.constant 9.99999974E-6 : f32
    %134 = vector.broadcast %cst_60 : f32 to vector<8x1xf32>
    %135 = arith.addf %131, %134 : vector<8x1xf32>
    %136 = math.rsqrt %135 : vector<8x1xf32>
    %137 = vector.broadcast %136 : vector<8x1xf32> to vector<8x32xf32>
    %138 = arith.mulf %133, %137 : vector<8x32xf32>
    %139 = vector.broadcast %117 : vector<1x32xf32> to vector<8x32xf32>
    %140 = arith.mulf %138, %139 : vector<8x32xf32>
    %141 = vector.broadcast %118 : vector<1x32xf32> to vector<8x32xf32>
    %142 = arith.addf %140, %141 : vector<8x32xf32>
    %c0_61 = arith.constant 0 : index
    %c0_62 = arith.constant 0 : index
    %143 = vector.load %arg19[%c0_61, %c0_62] : memref<32x64xf32, #tpu.memory_space<vmem>>, vector<32x64xf32>
    %cst_63 = arith.constant dense<0.000000e+00> : vector<8x64xf32>
    %144 = tpu.matmul %142, %143, %cst_63 {dimension_numbers = #tpu.dot_dimension_numbers<[1], [0], [0], [1], [0, 0, 1, 1], [], []>} : vector<8x32xf32>, vector<32x64xf32>, vector<8x64xf32> -> vector<8x64xf32>
    %c0_64 = arith.constant 0 : index
    %c0_65 = arith.constant 0 : index
    %145 = vector.load %arg20[%c0_64, %c0_65] : memref<1x64xf32, #tpu.memory_space<vmem>>, vector<1x64xf32>
    %146 = vector.broadcast %145 : vector<1x64xf32> to vector<8x64xf32>
    %147 = arith.addf %144, %146 : vector<8x64xf32>
    %148 = vector.extract_strided_slice %147 {offsets = [0, 0], sizes = [8, 32], strides = [1, 1]} : vector<8x64xf32> to vector<8x32xf32>
    %149 = vector.extract_strided_slice %147 {offsets = [0, 32], sizes = [8, 32], strides = [1, 1]} : vector<8x64xf32> to vector<8x32xf32>
    %150 = arith.negf %149 : vector<8x32xf32>
    %151 = math.exp %150 : vector<8x32xf32>
    %cst_66 = arith.constant 1.000000e+00 : f32
    %152 = vector.broadcast %cst_66 : f32 to vector<8x32xf32>
    %153 = arith.addf %152, %151 : vector<8x32xf32>
    %154 = arith.divf %152, %153 : vector<8x32xf32>
    %155 = arith.mulf %148, %154 : vector<8x32xf32>
    %c0_67 = arith.constant 0 : index
    %c0_68 = arith.constant 0 : index
    %156 = vector.load %arg21[%c0_67, %c0_68] : memref<32x128xf32, #tpu.memory_space<vmem>>, vector<32x128xf32>
    %cst_69 = arith.constant dense<0.000000e+00> : vector<8x128xf32>
    %157 = tpu.matmul %155, %156, %cst_69 {dimension_numbers = #tpu.dot_dimension_numbers<[1], [0], [0], [1], [0, 0, 1, 1], [], []>} : vector<8x32xf32>, vector<32x128xf32>, vector<8x128xf32> -> vector<8x128xf32>
    %c0_70 = arith.constant 0 : index
    %c0_71 = arith.constant 0 : index
    %158 = vector.load %arg22[%c0_70, %c0_71] : memref<1x128xf32, #tpu.memory_space<vmem>>, vector<1x128xf32>
    %159 = vector.broadcast %158 : vector<1x128xf32> to vector<8x128xf32>
    %160 = arith.addf %157, %159 : vector<8x128xf32>
    %161 = tpu.iota {dimensions = array<i32: 1>} : vector<8x128xi32>
    %c8_i32 = arith.constant 8 : i32
    %162 = vector.broadcast %c8_i32 : i32 to vector<8x128xi32>
    %163 = arith.cmpi sge, %161, %162 : vector<8x128xi32>
    %cst_72 = arith.constant 0.000000e+00 : f32
    %164 = vector.broadcast %cst_72 : f32 to vector<8x128xf32>
    %165 = arith.maximumf %160, %164 : vector<8x128xf32>
    %166 = vector.broadcast %cst_72 : f32 to vector<8x128xf32>
    %167 = arith.subf %160, %166 : vector<8x128xf32>
    %168 = arith.cmpf one, %167, %167 : vector<8x128xf32>
    %169 = vector.broadcast %cst_72 : f32 to vector<8x128xf32>
    %170 = arith.addf %160, %169 : vector<8x128xf32>
    %171 = math.absf %167 : vector<8x128xf32>
    %cst_73 = arith.constant 0.000000e+00 : f32
    %172 = vector.broadcast %cst_73 : f32 to vector<8x128xf32>
    %173 = arith.subf %172, %171 : vector<8x128xf32>
    %174 = math.exp %173 : vector<8x128xf32>
    %175 = math.log1p %174 : vector<8x128xf32>
    %176 = arith.addf %165, %175 : vector<8x128xf32>
    %177 = arith.select %168, %170, %176 : vector<8x128xi1>, vector<8x128xf32>
    %178 = arith.select %163, %177, %160 : vector<8x128xi1>, vector<8x128xf32>
    %c0_74 = arith.constant 0 : index
    %c0_75 = arith.constant 0 : index
    %179 = vector.load %arg23[%c0_74, %c0_75] : memref<8x128xf32, #tpu.memory_space<vmem>>, vector<8x128xf32>
    tpu.vector_store %arg23[%c0_74, %c0_75], %178 {strides = array<i32>} : memref<8x128xf32, #tpu.memory_space<vmem>>, vector<8x128xf32>,
    return
  }
}

</mosaic_0001>

<bundles_post_ra>
// kernel: tpu_custom_call.1
= control target key start
LH: loop header
LB: loop body
LE: loop exit
PB: predicated region body
PF: predicated region fallthrough
CT: control target
= control target key end

     0   :  { %s1322_s0 = inlined_call_operand.hbm [shape: f32[8,16], index: 0, kind: input, shape index: {}]   ;;  %s1323_s1 = inlined_call_operand.hbm [shape: f32[16,64], index: 1, kind: input, shape index: {}]   ;;  %s1324_s2 = inlined_call_operand.vmem [shape: f32[1,64], index: 2, kind: input, shape index: {}]   ;;  %s1325_s3 = inlined_call_operand.hbm [shape: f32[32,64], index: 3, kind: input, shape index: {}]   ;;  %s1326_s4 = inlined_call_operand.vmem [shape: f32[1,64], index: 4, kind: input, shape index: {}]   ;;  %s1327_s5 = inlined_call_operand.vmem [shape: f32[1,32], index: 5, kind: input, shape index: {}]   ;;  %s1328_s6 = inlined_call_operand.vmem [shape: f32[1,32], index: 6, kind: input, shape index: {}]   ;;  %s1329_s7 = inlined_call_operand.hbm [shape: f32[32,64], index: 7, kind: input, shape index: {}]   ;;  %s1330_s8 = inlined_call_operand.vmem [shape: f32[1,64], index: 8, kind: input, shape index: {}]   ;;  %s1331_s9 = inlined_call_operand.hbm [shape: f32[32,32], index: 9, kind: input, shape index: {}]   ;;  %s1332_s10 = inlined_call_operand.vmem [shape: f32[1,32], index: 10, kind: input, shape index: {}]   ;;  %s1333_s11 = inlined_call_operand.vmem [shape: f32[1,32], index: 11, kind: input, shape index: {}]   ;;  %s1334_s12 = inlined_call_operand.vmem [shape: f32[1,32], index: 12, kind: input, shape index: {}]   ;;  %s1335_s13 = inlined_call_operand.hbm [shape: f32[32,64], index: 13, kind: input, shape index: {}]   ;;  %s1336_s14 = inlined_call_operand.vmem [shape: f32[1,64], index: 14, kind: input, shape index: {}]   ;;  %s1337_s15 = inlined_call_operand.hbm [shape: f32[32,32], index: 15, kind: input, shape index: {}]   ;;  %s1338_s16 = inlined_call_operand.vmem [shape: f32[1,32], index: 16, kind: input, shape index: {}]   ;;  %s1339_s17 = inlined_call_operand.vmem [shape: f32[1,32], index: 17, kind: input, shape index: {}]   ;;  %s1340_s18 = inlined_call_operand.vmem [shape: f32[1,32], index: 18, kind: input, shape index: {}]   ;;  %s1341_s19 = inlined_call_operand.hbm [shape: f32[32,64], index: 19, kind: input, shape index: {}]   ;;  %s1342_s20 = inlined_call_operand.vmem [shape: f32[1,64], index: 20, kind: input, shape index: {}]   ;;  %s1343_s21 = inlined_call_operand.hbm [shape: f32[32,128], index: 21, kind: input, shape index: {}]   ;;  %s1344_s22 = inlined_call_operand.vmem [shape: f32[1,128], index: 22, kind: input, shape index: {}]   ;;  %s1345_s23 = inlined_call_operand.hbm [shape: f32[8,128], index: 23, kind: output, shape index: {}]  }
   0x1   :  { %1346 = sst [smem:[#allocation24_spill]] %s1322_s0 }
   0x2   :  { %1347 = sst [smem:[#allocation25_spill]] %s1323_s1 }
   0x3   :  { %1348 = sst [smem:[#allocation26_spill]] %s1324_s2 }
   0x4   :  { %1349 = sst [smem:[#allocation27_spill]] %s1325_s3 }
   0x5   :  { %1350 = sst [smem:[#allocation28_spill]] %s1326_s4 }
   0x6   :  { %1351 = sst [smem:[#allocation29_spill]] %s1327_s5 }
   0x7   :  { %1352 = sst [smem:[#allocation30_spill]] %s1328_s6 }
   0x8   :  { %1353 = sst [smem:[#allocation31_spill]] %s1329_s7 }
   0x9   :  { %28 = vsyncpa [#allocation3], 0 }
   0xa   :  { %29 = vsyncpa [#allocation6], 0 }
   0xb   :  { %30 = vsyncpa [#allocation9], 0 }
   0xc   :  { %31 = vsyncpa [#allocation12], 0 }
   0xd   :  { %32 = vsyncpa [#allocation15], 0  ;;  %s1354_s24 = sld [smem:[#allocation25_spill]] }
  0x13   :  { %s49_s25 = sshll.u32 %s1354_s24, 4  ;;  %s50_s25 = int_to_ptr.hbm [resolvable:$true] %s49_s25 }
  0x14   :  { %33 = vsyncpa [#allocation4], 0  ;;  %s1056_s5 = smov [#allocation5]   ;;  %s1355_s6 = sld [smem:[#allocation31_spill]] }
  0x15   :  { %s51_s1 = sshll.u32 %s1056_s5, 4  ;;  %s1057_s7 = smov 128   ;;  %s52_s1 = int_to_ptr.vmem [resolvable:$true] %s51_s1 }
  0x16   :  { %s1058_s28 = smov 8   ;;  %s1059_s29 = smov [#allocation8]  }
  0x17   :  { %57 = dma.hbm_to_vmem [thread:$0]  %s50_s25, 256, %s52_s1, [#allocation6], %s1057_s7, %s1057_s7, %s1058_s28  }
  0x18   :  { %s85_s3 = sshll.u32 %s1059_s29, 4  ;;  %s117_s30 = sshll.u32 %s1335_s13, 4  ;;  %s86_s3 = int_to_ptr.vmem [resolvable:$true] %s85_s3  ;;  %s118_s30 = int_to_ptr.hbm [resolvable:$true] %s117_s30 }
  0x19   :  { %s151_s26 = sshll.u32 %s1341_s19, 4  ;;  %s1060_s2 = smov [#allocation11]   ;;  %s152_s26 = int_to_ptr.hbm [resolvable:$true] %s151_s26 }
  0x1a   :  { %s83_s27 = sshll.u32 %s1355_s6, 4  ;;  %s119_s6 = sshll.u32 %s1060_s2, 4  ;;  %s84_s27 = int_to_ptr.hbm [resolvable:$true] %s83_s27  ;;  %s120_s6 = int_to_ptr.vmem [resolvable:$true] %s119_s6 }
  0x1b   :  { %91 = dma.hbm_to_vmem [thread:$0]  %s84_s27, 512, %s86_s3, [#allocation9], %s1057_s7, %s1057_s7, %s1058_s28  }
  0x1c   :  { %125 = dma.hbm_to_vmem [thread:$0]  %s118_s30, 512, %s120_s6, [#allocation12], %s1057_s7, %s1057_s7, %s1058_s28  }
  0x1d   :  { %s1061_s25 = smov [#allocation14]   ;;  %s1356_s0 = sld [smem:[#allocation24_spill]] }
  0x1e   :  { %s153_s13 = sshll.u32 %s1061_s25, 4  ;;  %s1357_s3 = sld [smem:[#allocation27_spill]]  ;;  %s154_s13 = int_to_ptr.vmem [resolvable:$true] %s153_s13 }
  0x1f   :  { %159 = dma.hbm_to_vmem [thread:$0]  %s152_s26, 512, %s154_s13, [#allocation15], %s1057_s7, %s1057_s7, %s1058_s28  }
  0x20   :  { %s1062_s5 = smov [#allocation2]   ;;  %s1063_s30 = smov [#allocation7]  }
  0x21   :  { %s41_s2 = sshll.u32 %s1062_s5, 4  ;;  %s66_s6 = sshll.u32 %s1063_s30, 4  ;;  %s42_s2 = int_to_ptr.vmem [resolvable:$true] %s41_s2  ;;  %s67_s6 = int_to_ptr.vmem [resolvable:$true] %s66_s6 }
  0x22   :  { %s98_s29 = sshll.u32 %s1331_s9, 4  ;;  %s1064_s19 = smov [#allocation10]   ;;  %s99_s29 = int_to_ptr.hbm [resolvable:$true] %s98_s29 }
  0x23   :  { %s39_s4 = sshll.u32 %s1356_s0, 4  ;;  %s132_s0 = sshll.u32 %s1337_s15, 4  ;;  %s40_s4 = int_to_ptr.hbm [resolvable:$true] %s39_s4  ;;  %s133_s0 = int_to_ptr.hbm [resolvable:$true] %s132_s0 }
  0x24   :  { %s64_s24 = sshll.u32 %s1357_s3, 4  ;;  %s100_s27 = sshll.u32 %s1064_s19, 4  ;;  %s65_s24 = int_to_ptr.hbm [resolvable:$true] %s64_s24  ;;  %s101_s27 = int_to_ptr.vmem [resolvable:$true] %s100_s27 }
  0x25   :  { %44 = dma.hbm_to_vmem [thread:$0]  %s40_s4, 128, %s42_s2, [#allocation3]  }
  0x26   :  { %72 = dma.hbm_to_vmem [thread:$0]  %s65_s24, 512, %s67_s6, [#allocation6], %s1057_s7, %s1057_s7, %s1058_s28  }
  0x27   :  { %106 = dma.hbm_to_vmem [thread:$0]  %s99_s29, 512, %s101_s27, [#allocation9], %s1057_s7, %s1057_s7, %s1058_s28  }
  0x28   :  { %s1065_s4 = smov [#allocation13]   ;;  %s166_s2 = sshll.u32 %s1343_s21, 4  ;;  %s167_s2 = int_to_ptr.hbm [resolvable:$true] %s166_s2 }
  0x29   :  { %s134_s9 = sshll.u32 %s1065_s4, 4  ;;  %s1066_s15 = smov [#allocation16]   ;;  %s135_s9 = int_to_ptr.vmem [resolvable:$true] %s134_s9 }
  0x2a   :  { %140 = dma.hbm_to_vmem [thread:$0]  %s133_s0, 512, %s135_s9, [#allocation12], %s1057_s7, %s1057_s7, %s1058_s28  }
  0x2b   :  { %s168_s24 = sshll.u32 %s1066_s15, 4  ;;  %s169_s24 = int_to_ptr.vmem [resolvable:$true] %s168_s24 }
  0x2c   :  { %174 = dma.hbm_to_vmem [thread:$0]  %s167_s2, 512, %s169_s24, [#allocation15], %s1057_s7, %s1057_s7, %s1058_s28  }
  0x2d   :  { %1044 = dma.done.wait [#allocation3], 128  }
  0x2e   :  { %1045 = vsyncadd [#allocation3], 4294967168 }
  0x2f   :  { %1046 = dma.done.wait [#allocation6], 768  }
  0x30   :  { %1047 = vsyncadd [#allocation6], 4294966528 }
  0x31   :  { %1048 = dma.done.wait [#allocation9], 1024  }
  0x32   :  { %1049 = vsyncadd [#allocation9], 4294966272 }
  0x33   :  { %1050 = dma.done.wait [#allocation12], 1024  }
  0x34   :  { %1051 = vsyncadd [#allocation12], 4294966272 }
  0x35   :  { %1052 = dma.done.wait [#allocation15], 1024  }
  0x36   :  { %1053 = vsyncadd [#allocation15], 4294966272  ;;  %v215_v0 = vld [vmem:[#allocation5 + $0x8] sm:$0xff]  ;;  %v214_v1 = vld [vmem:[#allocation5] sm:$0xff]  ;;  %vm220_vm0 = vcmask 130048   ;;  %s1358_s7 = sld [smem:[#allocation26_spill]] }
  0x37   :  { %238 = vmatpush.msra.mxu0 %v215_v0  ;;  %v213_v2 = vld [vmem:[#allocation2] sm:$0xff]  ;;  %v271_v4 = vld [vmem:[#allocation7 + $0x18] sm:$0xff]  ;;  %v270_v5 = vld [vmem:[#allocation7 + $0x10] sm:$0xff]  ;;  %s1067_s28 = smov 96   ;;  %vm276_vm5 = vcmask 261120   ;;  %s1359_s1 = sld [smem:[#allocation28_spill]] }
  0x38   :  { %292 = vmatpush.msra.mxu1 %v271_v4  ;;  %v269_v8 = vld [vmem:[#allocation7 + $0x8] sm:$0xff]  ;;  %v268_v22 = vld [vmem:[#allocation7] sm:$0xff]  ;;  %v1068_v44 = vmov 32.0   ;;  %v366_v56 = vld [vmem:[#allocation8 + $0x18] sm:$0xff]  ;;  %s1360_s13 = sld [smem:[#allocation29_spill]]  ;;  %s717_s29 = sshll.u32 %s1345_s23, 4  ;;  %s718_s29 = int_to_ptr.hbm [resolvable:$true] %s717_s29 }
  0x39   :  { %239 = vmatpush.msra.mxu0 %v214_v1  ;;  %386 = vmatpush.msra.mxu2 %v366_v56  ;;  %v365_v57 = vld [vmem:[#allocation8 + $0x10] sm:$0xff]  ;;  %v364_v58 = vld [vmem:[#allocation8 + $0x8] sm:$0xff]  ;;  %v363_v59 = vld [vmem:[#allocation8] sm:$0xff]  ;;  %s1361_s27 = sld [smem:[#allocation30_spill]] }
  0x3a   :  { %731 = vmatmul.msk.f32.vlgmr.msra.gmra.mxu0 %vm220_vm0, %v213_v2  ;;  %293 = vmatpush.msra.mxu1 %v270_v5 }
  0x3b   :  { %387 = vmatpush.msra.mxu2 %v365_v57  ;;  %v764_v57 = vld [vmem:[%s1333_s11] ss:$0 sm:$0xff] }
  0x3c   :  { %v758_v3 = vld [vmem:[%s1358_s7] ss:$0 sm:$0xff]  ;;  %294 = vmatpush.msra.mxu1 %v269_v8 }
  0x3d   :  { %v759_v25 = vld [vmem:[%s1359_s1] ss:$0 sm:$0xff]  ;;  %388 = vmatpush.msra.mxu2 %v364_v58 }
  0x3e   :  { %295 = vmatpush.msra.mxu1 %v268_v22  ;;  %v760_v5 = vld [vmem:[%s1360_s13] ss:$0 sm:$0xff] }
  0x3f   :  { %389 = vmatpush.msra.mxu2 %v363_v59  ;;  %v761_v8 = vld [vmem:[%s1361_s27] ss:$0 sm:$0xff] }
  0xb7   :  { %v241_v6 = vpop.f32.mrf.mxu0 }
  0xb8   :  { %v242_v7 = vadd.f32 %v758_v3, %v241_v6 }
  0xba   :  { %v732_v9 = vmul.f32 -1.442695, %v242_v7 }
  0xbc   :  { %772 = vpow2.f32 %v732_v9 }
  0xc2   :  { %v773_v10 = vpop.eup %772 }
  0xc3   :  { %v247_v11 = vadd.f32 1.0, %v773_v10 }
  0xc5   :  { %774 = vrcp.f32 %v247_v11  ;;  %v259_v15 = vand.u32 2147483648, %v247_v11  ;;  %v257_v17 = vand.u32 2147483647, %v247_v11  ;;  %vm253_vm2 = vweird.f32 %v247_v11 }
  0xc7   :  { %v260_v19 = vor.u32 1.1754944e-38, %v259_v15  ;;  %vm258_vm4 = vcmp.eq.f32.partialorder %v257_v17, 8.507059e+37 }
  0xcb   :  { %v775_v12 = vpop.eup %774 }
  0xcc   :  { %v249_v13 = vmul.f32 %v775_v12, %v247_v11  ;;  %vm254_vm1 = vweird.f32 %v775_v12  ;;  %v762_v11 = vld [vmem:[%s1330_s8] ss:$0 sm:$0xff] }
  0xcd   :  { %vm255_vm3 = vmor %vm253_vm2, %vm254_vm1 }
  0xce   :  { %v250_v14 = vsub.f32 1.0, %v249_v13  ;;  %v420_v13 = vld [vmem:[#allocation10 + $0x10] sm:$0xff] }
  0xd0   :  { %v251_v16 = vmul.f32 %v775_v12, %v250_v14 }
  0xd2   :  { %v252_v18 = vadd.f32 %v775_v12, %v251_v16  ;;  %v419_v16 = vld [vmem:[#allocation10 + $0x8] sm:$0xff] }
  0xd4   :  { %v256_v20 = vsel %vm255_vm3, %v775_v12, %v252_v18  ;;  %v421_v12 = vld [vmem:[#allocation10 + $0x18] sm:$0xff] }
  0xd5   :  { %v261_v21 = vsel %vm258_vm4, %v260_v19, %v256_v20  ;;  %441 = vmatpush.msra.mxu3 %v421_v12 }
  0xd6   :  { %264 = vrot.lane.b32.xlu0 %v261_v21, %s1067_s28 }
  0xd7   :  { %442 = vmatpush.msra.mxu3 %v420_v13 }
  0xd9   :  { %443 = vmatpush.msra.mxu3 %v419_v16 }
 0x148   :  { %v265_v23 = vpop.permute.xlu0 %264 }
 0x149   :  { %v267_v24 = vmul.f32 %v265_v23, %v242_v7 }
 0x14b   :  { %733 = vmatmul.msk.f32.vlgmr.msra.gmra.mxu1 %vm276_vm5, %v267_v24 }
 0x1c8   :  { %v297_v26 = vpop.f32.mrf.mxu1 }
 0x1c9   :  { %v298_v27 = vadd.f32 %v759_v25, %v297_v26 }
 0x1cb   :  { %v734_v28 = vmul.f32 -1.442695, %v298_v27 }
 0x1cd   :  { %776 = vpow2.f32 %v734_v28 }
 0x1d3   :  { %v777_v29 = vpop.eup %776 }
 0x1d4   :  { %v303_v30 = vadd.f32 1.0, %v777_v29 }
 0x1d6   :  { %778 = vrcp.f32 %v303_v30  ;;  %v315_v34 = vand.u32 2147483648, %v303_v30  ;;  %v313_v36 = vand.u32 2147483647, %v303_v30  ;;  %vm309_vm7 = vweird.f32 %v303_v30 }
 0x1d7   :  { %780 = vrcp.f32 %v1068_v44  ;;  %v485_v44 = vld [vmem:[#allocation11 + $0x18] sm:$0xff] }
 0x1d8   :  { %v316_v38 = vor.u32 1.1754944e-38, %v315_v34  ;;  %vm314_vm9 = vcmp.eq.f32.partialorder %v313_v36, 8.507059e+37  ;;  %505 = vmatpush.msrb.mxu0 %v485_v44 }
 0x1dc   :  { %v779_v31 = vpop.eup %778 }
 0x1dd   :  { %v305_v32 = vmul.f32 %v779_v31, %v303_v30  ;;  %vm310_vm6 = vweird.f32 %v779_v31  ;;  %v781_v45 = vpop.eup %780  ;;  %v418_v30 = vld [vmem:[#allocation10] sm:$0xff] }
 0x1de   :  { %vm311_vm8 = vmor %vm309_vm7, %vm310_vm6  ;;  %v330_v46 = vmul.f32 32.0, %v781_v45  ;;  %vm334_vm10 = vweird.f32 %v781_v45  ;;  %444 = vmatpush.msra.mxu3 %v418_v30 }
 0x1df   :  { %v306_v33 = vsub.f32 1.0, %v305_v32 }
 0x1e0   :  { %v331_v47 = vsub.f32 1.0, %v330_v46  ;;  %v483_v46 = vld [vmem:[#allocation11 + $0x8] sm:$0xff] }
 0x1e1   :  { %v307_v35 = vmul.f32 %v779_v31, %v306_v33  ;;  %v763_v33 = vld [vmem:[%s1332_s10] ss:$0 sm:$0xff] }
 0x1e2   :  { %v332_v48 = vmul.f32 %v781_v45, %v331_v47 }
 0x1e3   :  { %v308_v37 = vadd.f32 %v779_v31, %v307_v35 }
 0x1e4   :  { %v333_v49 = vadd.f32 %v781_v45, %v332_v48 }
 0x1e5   :  { %v312_v39 = vsel %vm311_vm8, %v779_v31, %v308_v37 }
 0x1e6   :  { %v317_v40 = vsel %vm314_vm9, %v316_v38, %v312_v39  ;;  %v1254_v50 = vsel %vm334_vm10, %v781_v45, %v333_v49  ;;  %v484_v45 = vld [vmem:[#allocation11 + $0x10] sm:$0xff] }
 0x1e7   :  { %320 = vrot.lane.b32.xlu0 %v317_v40, %s1067_s28  ;;  %506 = vmatpush.msrb.mxu0 %v484_v45  ;;  %v768_v45 = vld [vmem:[%s1339_s17] ss:$0 sm:$0xff] }
 0x1e9   :  { %507 = vmatpush.msrb.mxu0 %v483_v46 }
 0x259   :  { %v321_v41 = vpop.permute.xlu0 %320 }
 0x25a   :  { %v1250_v42 = vmul.f32 %v321_v41, %v298_v27 }
 0x25c   :  { %v326_v43 = vsel %vm276_vm5, %v1250_v42, 0.0 }
 0x25d   :  { %327 = vadd.xlane.f32.xlu1 %v326_v43 }
 0x2d0   :  { %v328_v51 = vpop.xlane.xlu1 %327 }
 0x2d1   :  { %v336_v52 = vmul.f32 %v1254_v50, %v328_v51 }
 0x2d3   :  { %v337_v53 = vsub.f32 %v1250_v42, %v336_v52 }
 0x2d5   :  { %v338_v54 = vmul.f32 %v337_v53, %v337_v53 }
 0x2d7   :  { %v339_v55 = vsel %vm276_vm5, %v338_v54, 0.0 }
 0x2d8   :  { %340 = vadd.xlane.f32.xlu1 %v339_v55 }
 0x34b   :  { %v341_v60 = vpop.xlane.xlu1 %340 }
 0x34c   :  { %v342_v61 = vmul.f32 %v341_v60, %v1254_v50  ;;  %v765_v60 = vld [vmem:[%s1334_s12] ss:$0 sm:$0xff] }
 0x34e   :  { %v343_v62 = vadd.f32 1e-05, %v342_v61 }
 0x350   :  { %782 = vrsqrt.f32 %v343_v62  ;;  %vm350_vm12 = vweird.f32 %v343_v62 }
 0x356   :  { %v783_v63 = vpop.eup %782 }
 0x357   :  { %v345_v0 = vmul.f32 %v783_v63, %v343_v62  ;;  %vm351_vm11 = vweird.f32 %v783_v63 }
 0x358   :  { %vm352_vm13 = vmor %vm350_vm12, %vm351_vm11 }
 0x359   :  { %v346_v1 = vmul.f32 %v783_v63, %v345_v0  ;;  %v540_v0 = vld [vmem:[#allocation13 + $0x18] sm:$0xff] }
 0x35a   :  { %560 = vmatpush.msrb.mxu1 %v540_v0 }
 0x35b   :  { %v347_v2 = vmul.f32 0.5, %v346_v1  ;;  %v539_v1 = vld [vmem:[#allocation13 + $0x10] sm:$0xff] }
 0x35c   :  { %561 = vmatpush.msrb.mxu1 %v539_v1 }
 0x35d   :  { %v348_v3 = vsub.f32 1.5, %v347_v2 }
 0x35f   :  { %v349_v4 = vmul.f32 %v783_v63, %v348_v3 }
 0x361   :  { %v353_v6 = vsel %vm352_vm13, %v783_v63, %v349_v4  ;;  %v766_v63 = vld [vmem:[%s1336_s14] ss:$0 sm:$0xff] }
 0x362   :  { %v354_v7 = vmul.f32 %v353_v6, %v337_v53  ;;  %v538_v4 = vld [vmem:[#allocation13 + $0x8] sm:$0xff] }
 0x363   :  { %562 = vmatpush.msrb.mxu1 %v538_v4 }
 0x364   :  { %v358_v9 = vmul.f32 %v760_v5, %v354_v7 }
 0x366   :  { %v362_v10 = vadd.f32 %v761_v8, %v358_v9 }
 0x368   :  { %735 = vmatmul.msk.f32.vlgmr.msra.gmra.mxu2 %vm276_vm5, %v362_v10 }
 0x3eb   :  { %v391_v14 = vpop.f32.mrf.mxu2 }
 0x3ec   :  { %v392_v15 = vadd.f32 %v762_v11, %v391_v14 }
 0x3ee   :  { %v736_v17 = vmul.f32 -1.442695, %v392_v15 }
 0x3f0   :  { %784 = vpow2.f32 %v736_v17 }
 0x3f6   :  { %v785_v18 = vpop.eup %784 }
 0x3f7   :  { %v397_v19 = vadd.f32 1.0, %v785_v18  ;;  %v537_v18 = vld [vmem:[#allocation13] sm:$0xff] }
 0x3f8   :  { %563 = vmatpush.msrb.mxu1 %v537_v18 }
 0x3f9   :  { %786 = vrcp.f32 %v397_v19  ;;  %v409_v23 = vand.u32 2147483648, %v397_v19  ;;  %v407_v25 = vand.u32 2147483647, %v397_v19  ;;  %vm403_vm15 = vweird.f32 %v397_v19 }
 0x3fb   :  { %v410_v27 = vor.u32 1.1754944e-38, %v409_v23  ;;  %vm408_vm1 = vcmp.eq.f32.partialorder %v407_v25, 8.507059e+37 }
 0x3ff   :  { %v787_v20 = vpop.eup %786 }
 0x400   :  { %v399_v21 = vmul.f32 %v787_v20, %v397_v19  ;;  %vm404_vm14 = vweird.f32 %v787_v20 }
 0x401   :  { %vm405_vm0 = vmor %vm403_vm15, %vm404_vm14 }
 0x402   :  { %v400_v22 = vsub.f32 1.0, %v399_v21  ;;  %v767_v21 = vld [vmem:[%s1338_s16] ss:$0 sm:$0xff] }
 0x404   :  { %v401_v24 = vmul.f32 %v787_v20, %v400_v22 }
 0x406   :  { %v402_v26 = vadd.f32 %v787_v20, %v401_v24 }
 0x408   :  { %v406_v28 = vsel %vm405_vm0, %v787_v20, %v402_v26 }
 0x409   :  { %v411_v29 = vsel %vm408_vm1, %v410_v27, %v406_v28 }
 0x40a   :  { %414 = vrot.lane.b32.xlu2 %v411_v29, %s1067_s28 }
 0x464   :  { %v415_v31 = vpop.permute.xlu2 %414 }
 0x465   :  { %v417_v32 = vmul.f32 %v415_v31, %v392_v15  ;;  %v604_v31 = vld [vmem:[#allocation14 + $0x18] sm:$0xff] }
 0x466   :  { %624 = vmatpush.msrb.mxu2 %v604_v31 }
 0x467   :  { %737 = vmatmul.msk.f32.vlgmr.msra.gmra.mxu3 %vm276_vm5, %v417_v32  ;;  %v603_v32 = vld [vmem:[#allocation14 + $0x10] sm:$0xff] }
 0x468   :  { %625 = vmatpush.msrb.mxu2 %v603_v32 }
 0x4ea   :  { %v446_v34 = vpop.f32.mrf.mxu3 }
 0x4eb   :  { %v447_v35 = vadd.f32 %v763_v33, %v446_v34  ;;  %v602_v33 = vld [vmem:[#allocation14 + $0x8] sm:$0xff]  ;;  %v601_v34 = vld [vmem:[#allocation14] sm:$0xff] }
 0x4ec   :  { %626 = vmatpush.msrb.mxu2 %v602_v33 }
 0x4ed   :  { %v1276_v36 = vadd.f32 %v447_v35, %v1250_v42  ;;  %v482_v42 = vld [vmem:[#allocation11] sm:$0xff] }
 0x4ee   :  { %508 = vmatpush.msrb.mxu0 %v482_v42  ;;  %627 = vmatpush.msrb.mxu2 %v601_v34 }
 0x4ef   :  { %v452_v37 = vsel %vm276_vm5, %v1276_v36, 0.0 }
 0x4f0   :  { %453 = vadd.xlane.f32.xlu2 %v452_v37 }
 0x563   :  { %v454_v38 = vpop.xlane.xlu2 %453 }
 0x564   :  { %v455_v39 = vmul.f32 %v454_v38, %v1254_v50 }
 0x566   :  { %v456_v40 = vsub.f32 %v1276_v36, %v455_v39 }
 0x568   :  { %v457_v41 = vmul.f32 %v456_v40, %v456_v40 }
 0x56a   :  { %v458_v43 = vsel %vm276_vm5, %v457_v41, 0.0 }
 0x56b   :  { %459 = vadd.xlane.f32.xlu0 %v458_v43 }
 0x5de   :  { %v460_v47 = vpop.xlane.xlu0 %459 }
 0x5df   :  { %v461_v48 = vmul.f32 %v460_v47, %v1254_v50 }
 0x5e1   :  { %v462_v49 = vadd.f32 1e-05, %v461_v48 }
 0x5e3   :  { %788 = vrsqrt.f32 %v462_v49  ;;  %vm469_vm3 = vweird.f32 %v462_v49 }
 0x5e9   :  { %v789_v51 = vpop.eup %788 }
 0x5ea   :  { %v464_v52 = vmul.f32 %v789_v51, %v462_v49  ;;  %vm470_vm2 = vweird.f32 %v789_v51  ;;  %v770_v49 = vld [vmem:[%s1342_s20] ss:$0 sm:$0xff]  ;;  %s1069_s20 = smov [#allocation17]  }
 0x5eb   :  { %vm471_vm4 = vmor %vm469_vm3, %vm470_vm2 }
 0x5ec   :  { %v465_v53 = vmul.f32 %v789_v51, %v464_v52  ;;  %v658_v52 = vld [vmem:[#allocation16 + $0x10] sm:$0xff] }
 0x5ee   :  { %v466_v54 = vmul.f32 0.5, %v465_v53 }
 0x5f0   :  { %v467_v55 = vsub.f32 1.5, %v466_v54 }
 0x5f2   :  { %v468_v56 = vmul.f32 %v789_v51, %v467_v55  ;;  %v657_v55 = vld [vmem:[#allocation16 + $0x8] sm:$0xff] }
 0x5f4   :  { %v472_v58 = vsel %vm471_vm4, %v789_v51, %v468_v56  ;;  %v659_v51 = vld [vmem:[#allocation16 + $0x18] sm:$0xff] }
 0x5f5   :  { %v473_v59 = vmul.f32 %v472_v58, %v456_v40  ;;  %679 = vmatpush.msrb.mxu3 %v659_v51 }
 0x5f7   :  { %v477_v61 = vmul.f32 %v764_v57, %v473_v59  ;;  %680 = vmatpush.msrb.mxu3 %v658_v52 }
 0x5f9   :  { %v481_v62 = vadd.f32 %v765_v60, %v477_v61  ;;  %681 = vmatpush.msrb.mxu3 %v657_v55 }
 0x5fb   :  { %738 = vmatmul.msk.f32.vlgmr.msrb.gmra.mxu0 %vm276_vm5, %v481_v62 }
 0x678   :  { %v510_v2 = vpop.f32.mrf.mxu0 }
 0x679   :  { %v511_v3 = vadd.f32 %v766_v63, %v510_v2 }
 0x67b   :  { %v739_v5 = vmul.f32 -1.442695, %v511_v3 }
 0x67d   :  { %790 = vpow2.f32 %v739_v5  ;;  %v656_v5 = vld [vmem:[#allocation16] sm:$0xff] }
 0x67e   :  { %682 = vmatpush.msrb.mxu3 %v656_v5 }
 0x683   :  { %v791_v6 = vpop.eup %790 }
 0x684   :  { %v516_v7 = vadd.f32 1.0, %v791_v6 }
 0x686   :  { %792 = vrcp.f32 %v516_v7  ;;  %v528_v11 = vand.u32 2147483648, %v516_v7  ;;  %v526_v13 = vand.u32 2147483647, %v516_v7  ;;  %vm522_vm7 = vweird.f32 %v516_v7 }
 0x688   :  { %v529_v15 = vor.u32 1.1754944e-38, %v528_v11  ;;  %vm527_vm9 = vcmp.eq.f32.partialorder %v526_v13, 8.507059e+37 }
 0x68c   :  { %v793_v8 = vpop.eup %792 }
 0x68d   :  { %v518_v9 = vmul.f32 %v793_v8, %v516_v7  ;;  %vm523_vm6 = vweird.f32 %v793_v8 }
 0x68e   :  { %vm524_vm8 = vmor %vm522_vm7, %vm523_vm6 }
 0x68f   :  { %v519_v10 = vsub.f32 1.0, %v518_v9 }
 0x691   :  { %v520_v12 = vmul.f32 %v793_v8, %v519_v10 }
 0x693   :  { %v521_v14 = vadd.f32 %v793_v8, %v520_v12 }
 0x695   :  { %v525_v16 = vsel %vm524_vm8, %v793_v8, %v521_v14  ;;  %v771_v8 = vld [vmem:[%s1344_s22] ss:$0 sm:$0xff]  ;;  %s715_s22 = sshll.u32 %s1069_s20, 4  ;;  %s716_s22 = int_to_ptr.vmem [resolvable:$true] %s715_s22 }
 0x696   :  { %v530_v17 = vsel %vm527_vm9, %v529_v15, %v525_v16 }
 0x697   :  { %533 = vrot.lane.b32.xlu1 %v530_v17, %s1067_s28  ;;  %v687_v17 = vlaneseq }
 0x709   :  { %v534_v19 = vpop.permute.xlu1 %533 }
 0x70a   :  { %v536_v20 = vmul.f32 %v534_v19, %v511_v3 }
 0x70c   :  { %740 = vmatmul.msk.f32.vlgmr.msrb.gmra.mxu1 %vm276_vm5, %v536_v20 }
 0x789   :  { %v565_v22 = vpop.f32.mrf.mxu1 }
 0x78a   :  { %v566_v23 = vadd.f32 %v767_v21, %v565_v22  ;;  %v688_v21 = vand.u32 127, %v687_v17 }
 0x78c   :  { %v568_v24 = vadd.f32 %v566_v23, %v1276_v36  ;;  %vm689_vm1 = vcmp.ge.s32.totalorder %v688_v21, 8 }
 0x78e   :  { %v571_v25 = vsel %vm276_vm5, %v568_v24, 0.0 }
 0x78f   :  { %572 = vadd.xlane.f32.xlu1 %v571_v25 }
 0x802   :  { %v573_v26 = vpop.xlane.xlu1 %572 }
 0x803   :  { %v574_v27 = vmul.f32 %v573_v26, %v1254_v50 }
 0x805   :  { %v575_v28 = vsub.f32 %v568_v24, %v574_v27 }
 0x807   :  { %v576_v29 = vmul.f32 %v575_v28, %v575_v28 }
 0x809   :  { %v577_v30 = vsel %vm276_vm5, %v576_v29, 0.0 }
 0x80a   :  { %578 = vadd.xlane.f32.xlu2 %v577_v30 }
 0x87d   :  { %v579_v35 = vpop.xlane.xlu2 %578 }
 0x87e   :  { %v580_v36 = vmul.f32 %v579_v35, %v1254_v50  ;;  %v769_v50 = vld [vmem:[%s1340_s18] ss:$0 sm:$0xff] }
 0x880   :  { %v581_v37 = vadd.f32 1e-05, %v580_v36 }
 0x882   :  { %794 = vrsqrt.f32 %v581_v37  ;;  %vm588_vm11 = vweird.f32 %v581_v37 }
 0x888   :  { %v795_v38 = vpop.eup %794 }
 0x889   :  { %v583_v39 = vmul.f32 %v795_v38, %v581_v37  ;;  %vm589_vm10 = vweird.f32 %v795_v38 }
 0x88a   :  { %vm590_vm12 = vmor %vm588_vm11, %vm589_vm10 }
 0x88b   :  { %v584_v40 = vmul.f32 %v795_v38, %v583_v39 }
 0x88d   :  { %v585_v41 = vmul.f32 0.5, %v584_v40 }
 0x88f   :  { %v586_v43 = vsub.f32 1.5, %v585_v41 }
 0x891   :  { %v587_v44 = vmul.f32 %v795_v38, %v586_v43 }
 0x893   :  { %v591_v46 = vsel %vm590_vm12, %v795_v38, %v587_v44 }
 0x894   :  { %v592_v42 = vmul.f32 %v591_v46, %v575_v28 }
 0x896   :  { %v596_v47 = vmul.f32 %v768_v45, %v592_v42 }
 0x898   :  { %v600_v48 = vadd.f32 %v769_v50, %v596_v47 }
 0x89a   :  { %741 = vmatmul.msk.f32.vlgmr.msrb.gmra.mxu2 %vm276_vm5, %v600_v48 }
 0x91d   :  { %v629_v53 = vpop.f32.mrf.mxu2 }
 0x91e   :  { %v630_v54 = vadd.f32 %v770_v49, %v629_v53 }
 0x920   :  { %v742_v56 = vmul.f32 -1.442695, %v630_v54 }
 0x922   :  { %796 = vpow2.f32 %v742_v56 }
 0x928   :  { %v797_v57 = vpop.eup %796 }
 0x929   :  { %v635_v58 = vadd.f32 1.0, %v797_v57 }
 0x92b   :  { %798 = vrcp.f32 %v635_v58  ;;  %v647_v62 = vand.u32 2147483648, %v635_v58  ;;  %v645_v0 = vand.u32 2147483647, %v635_v58  ;;  %vm641_vm14 = vweird.f32 %v635_v58 }
 0x92d   :  { %v648_v2 = vor.u32 1.1754944e-38, %v647_v62  ;;  %vm646_vm0 = vcmp.eq.f32.partialorder %v645_v0, 8.507059e+37 }
 0x931   :  { %v799_v59 = vpop.eup %798 }
 0x932   :  { %v637_v60 = vmul.f32 %v799_v59, %v635_v58  ;;  %vm642_vm13 = vweird.f32 %v799_v59 }
 0x933   :  { %vm643_vm15 = vmor %vm641_vm14, %vm642_vm13 }
 0x934   :  { %v638_v61 = vsub.f32 1.0, %v637_v60 }
 0x936   :  { %v639_v63 = vmul.f32 %v799_v59, %v638_v61 }
 0x938   :  { %v640_v1 = vadd.f32 %v799_v59, %v639_v63 }
 0x93a   :  { %v644_v3 = vsel %vm643_vm15, %v799_v59, %v640_v1 }
 0x93b   :  { %v649_v4 = vsel %vm646_vm0, %v648_v2, %v644_v3 }
 0x93c   :  { %652 = vrot.lane.b32.xlu2 %v649_v4, %s1067_s28 }
 0x996   :  { %v653_v6 = vpop.permute.xlu2 %652 }
 0x997   :  { %v655_v7 = vmul.f32 %v653_v6, %v630_v54 }
 0x999   :  { %743 = vmatmul.msk.f32.vlgmr.msrb.gmra.mxu3 %vm276_vm5, %v655_v7 }
 0xa1c   :  { %v684_v9 = vpop.f32.mrf.mxu3 }
 0xa1d   :  { %v685_v10 = vadd.f32 %v771_v8, %v684_v9 }
 0xa1f   :  { %v693_v11 = vand.u32 2147483647, %v685_v10  ;;  %v690_v24 = vmax.f32 %v685_v10, 0.0  ;;  %vm691_vm2 = vcmp.ne.f32.partialorder %v685_v10, %v685_v10 }
 0xa21   :  { %v694_v12 = vsub.f32 0.0, %v693_v11 }
 0xa23   :  { %v695_v13 = vmul.f32 1.442695, %v694_v12 }
 0xa25   :  { %800 = vpow2.f32 %v695_v13 }
 0xa2b   :  { %v801_v14 = vpop.eup %800 }
 0xa2c   :  { %v697_v15 = vadd.f32 1.0, %v801_v14  ;;  %v700_v16 = vmul.f32 -0.5, %v801_v14  ;;  %v703_v19 = vand.u32 2147483647, %v801_v14 }
 0xa2e   :  { %802 = vlog2.f32 %v697_v15  ;;  %v701_v18 = vadd.f32 1.0, %v700_v16  ;;  %vm704_vm5 = vcmp.lt.f32.partialorder %v703_v19, 0.0004427343 }
 0xa30   :  { %v702_v23 = vmul.f32 %v801_v14, %v701_v18 }
 0xa34   :  { %v803_v20 = vpop.eup %802 }
 0xa35   :  { %v699_v22 = vmul.f32 0.6931472, %v803_v20 }
 0xa37   :  { %v705_v25 = vsel %vm704_vm5, %v702_v23, %v699_v22 }
 0xa38   :  { %v706_v26 = vadd.f32 %v705_v25, %v690_v24 }
 0xa3a   :  { %v707_v27 = vsel %vm691_vm2, %v685_v10, %v706_v26 }
 0xa3b   :  { %v708_v28 = vsel %vm689_vm1, %v707_v27, %v685_v10 }
 0xa3c   :  { %709 = vst [vmem:[#allocation17] sm:$0xff] %v708_v28 }
 0xa3d   :  { %720 = dma.vmem_to_hbm [thread:$0]  %s716_s22, 128, %s718_s29, [#allocation4]  }
 0xa3e   :  { %1054 = dma.done.wait [#allocation4], 128  }
 0xa3f   :  { %1055 = vsyncadd [#allocation4], 4294967168 }
 0xa40   :  { %725 = vsyncpa [#allocation3], 1 }
 0xa41   :  { %726 = vsyncpa [#allocation6], 1 }
 0xa42   :  { %727 = vsyncpa [#allocation9], 1 }
 0xa43   :  { %728 = vsyncpa [#allocation12], 1 }
 0xa44   :  { %729 = vsyncpa [#allocation15], 1 }
 0xa45   :  { %730 = vsyncpa [#allocation4], 1 }

</bundles_post_ra>
